<compile_context>
chip_gen: v7x
topology: tpu7x:2x2x1
jax: 0.10.0
libtpu: 0.0.40
codegen_flags: <defaults>
</compile_context>

<pallas_src>
import functools

import jax
import jax.numpy as jnp
from jax.experimental import pallas as pl
from jax.experimental.pallas import tpu as pltpu


def _positions_f32(offset_ref, tn, d2):
    # Absolute positions of this sequence tile: seq_tile_start + offset.
    seq_start = pl.program_id(1) * tn + offset_ref[0]
    return (jax.lax.broadcasted_iota(jnp.int32, (tn, d2), 0)
            + seq_start).astype(jnp.float32)


def _residual_store(o_ref, x_ref, pe_proj, f32_add):
    if f32_add:
        # f32 add (exact / v5e path); single cast on store.
        o_ref[...] = (x_ref[...].astype(jnp.float32)
                      + pe_proj[None]).astype(o_ref.dtype)
    else:
        # bf16 residual add (v6e/v7x): no full-block f32 upcast temp.
        o_ref[...] = x_ref[...] + pe_proj.astype(o_ref.dtype)[None]


def _mlp_pe_kernel_splitk(offset_ref, x_ref, theta_ref, w_sin_ref, w_cos_ref,
                          o_ref, *, f32_add):
    # x_ref     : VMEM (TB, TN, D)   one (batch, seq) tile
    # theta_ref : VMEM (1, D//2)     frequencies            (single-buffered)
    # w_sin_ref : VMEM (D//2, D)     = W[:, :D//2].T        (single-buffered)
    # w_cos_ref : VMEM (D//2, D)     = W[:, D//2:].T        (single-buffered)
    tn = x_ref.shape[1]
    d2 = theta_ref.shape[1]
    ang = _positions_f32(offset_ref, tn, d2) * theta_ref[...]   # VPU
    sin_a = jnp.sin(ang)                                        # EUP
    cos_a = jnp.cos(ang)                                        # EUP
    mxu = w_sin_ref.dtype
    # pe @ W.T == sin @ W[:, :D//2].T + cos @ W[:, D//2:].T  (split-K, MXU)
    pe_proj = jnp.dot(sin_a.astype(mxu), w_sin_ref[...],
                      preferred_element_type=jnp.float32)
    pe_proj = pe_proj + jnp.dot(cos_a.astype(mxu), w_cos_ref[...],
                                preferred_element_type=jnp.float32)
    _residual_store(o_ref, x_ref, pe_proj, f32_add)


def _mlp_pe_kernel_fullk(offset_ref, x_ref, theta_ref, w_t_ref, o_ref,
                         pe_scratch, *, f32_add):
    # Full-K variant (D//2 multiple of 128): sin/cos are stored into the two
    # lane-aligned halves of a (TN, D) scratch (contiguous stores, no
    # cross-lane concat) and a single K=D matmul fills the MXU.
    tn = x_ref.shape[1]
    d2 = theta_ref.shape[1]
    ang = _positions_f32(offset_ref, tn, d2) * theta_ref[...]
    pe_scratch[:, :d2] = jnp.sin(ang).astype(pe_scratch.dtype)
    pe_scratch[:, d2:] = jnp.cos(ang).astype(pe_scratch.dtype)
    pe_proj = jnp.dot(pe_scratch[...], w_t_ref[...],
                      preferred_element_type=jnp.float32)
    _residual_store(o_ref, x_ref, pe_proj, f32_add)


def _derive_tiles(b, n, d, x_itemsize, w_itemsize, budget, upcast_x, fullk):
    """Largest (tb, tn) whose block buffers + temps fit the VMEM budget."""
    sub = 8 if x_itemsize >= 4 else 16          # sublane multiple for x dtype
    d2 = d // 2
    fixed = d * d * w_itemsize + d2 * 4 + (2 << 20)  # weights + theta + margin
    avail = max(budget - fixed, 1 << 20)

    def per_row(tb):
        r = 4 * tb * d * x_itemsize             # x + out blocks, double-buffered
        r += 6 * d * 4                          # f32 pos/ang/sin/cos/pe temps
        if fullk:
            r += d * w_itemsize                 # pe VMEM scratch
        if upcast_x:
            r += tb * d * 4                     # f32 upcast of the x block
        return r

    def max_tn(tb):
        t = avail // per_row(tb)
        return n if t >= n else (t // sub) * sub

    tb = b
    while tb > 1 and max_tn(tb) < sub:          # shrink batch tile if needed
        tb = (tb + 1) // 2
    tn = max_tn(tb)
    if tn < sub:                                # last-resort minimal tile
        tn = min(n, sub)
    # Guarantee >= 2 grid steps when splittable (keeps both v7x TCs busy;
    # negligible extra per-step overhead on single-TC v5e/v6e).
    if (-(-b // tb)) * (-(-n // tn)) < 2 and n > sub:
        half_rounded = -(-(-(-n // 2)) // sub) * sub
        if half_rounded < n:
            tn = half_rounded
    return tb, tn


def mlp_pe(x, w, theta, offset=0, *, use_bf16_mxu=True, force_f32_add=False):
    """Fused MlpPe forward.

    x: (B, N, D); w: (D, D) nn.Linear weight (out, in); theta: (D//2,);
    offset: sequence offset (scalar-prefetched, no recompile per offset).
    """
    b, n, d = x.shape
    d2 = d // 2
    assert d == 2 * d2, "embed_dim must be even"

    x_itemsize = x.dtype.itemsize
    f32_add = force_f32_add or x.dtype == jnp.float32
    mxu_dtype = jnp.bfloat16 if use_bf16_mxu else jnp.float32
    w_itemsize = jnp.dtype(mxu_dtype).itemsize

    # One-time wrapper-side prep of the grid-invariant operands.
    theta2d = theta.reshape(1, d2).astype(jnp.float32)
    offset_arr = jnp.asarray([offset], dtype=jnp.int32)
    fullk = d2 % 128 == 0 and d2 > 0
    if fullk:
        consts = (theta2d, w.T.astype(mxu_dtype))                 # (D, D)
        kernel = _mlp_pe_kernel_fullk
    else:
        consts = (theta2d,
                  w[:, :d2].T.astype(mxu_dtype),                  # (D//2, D)
                  w[:, d2:].T.astype(mxu_dtype))                  # (D//2, D)
        kernel = _mlp_pe_kernel_splitk
    kernel = functools.partial(kernel, f32_add=f32_add)

    # Per-generation VMEM budget: ~48 MiB on v7x (64 MiB physical),
    # ~96 MiB on v5e/v6e (128 MiB physical).
    try:
        vmem_cap = int(pltpu.get_tpu_info().vmem_capacity_bytes)
    except Exception:
        vmem_cap = 64 << 20
    budget = vmem_cap * 3 // 4

    upcast_x = f32_add and x_itemsize < 4
    tb, tn = _derive_tiles(b, n, d, x_itemsize, w_itemsize, budget,
                           upcast_x, fullk)
    grid = (pl.cdiv(b, tb), pl.cdiv(n, tn))

    est = (d * d * w_itemsize + d2 * 4
           + tn * (4 * tb * d * x_itemsize + 6 * d * 4
                   + (d * w_itemsize if fullk else 0)
                   + (tb * d * 4 if upcast_x else 0)))
    vmem_limit = int(min(budget, max(est + (4 << 20), 32 << 20)))

    scratch_shapes = [pltpu.VMEM((tn, d), mxu_dtype)] if fullk else []
    data_spec = pl.BlockSpec((tb, tn, d), lambda bi, si, off: (bi, si, 0))

    # TODO(synk): if production embed_dim < 128, fold sequence into the lane
    # axis on the store path to avoid masked partial vst; moot for D >= 128.
    def build(single_buffer_consts):
        kw = {"pipeline_mode": pl.Buffered(1)} if single_buffer_consts else {}
        const_specs = [pl.BlockSpec(c.shape, lambda bi, si, off: (0, 0), **kw)
                       for c in consts]
        return pl.pallas_call(
            kernel,
            out_shape=jax.ShapeDtypeStruct((b, n, d), x.dtype),
            grid_spec=pltpu.PrefetchScalarGridSpec(
                num_scalar_prefetch=1,
                grid=grid,
                in_specs=[data_spec] + const_specs,
                out_specs=data_spec,
                scratch_shapes=scratch_shapes,
            ),
            compiler_params=pltpu.CompilerParams(
                dimension_semantics=("parallel", "parallel"),
                vmem_limit_bytes=vmem_limit,
            ),
        )

    try:
        return build(True)(offset_arr, x, *consts)
    except Exception:
        # Fallback for jax versions without BlockSpec pipeline_mode support.
        return build(False)(offset_arr, x, *consts)


if __name__ == "__main__":
    def reference(x, w, theta, offset):
        n = x.shape[1]
        pos = jnp.arange(offset, offset + n, dtype=jnp.float32)[:, None]
        ang = pos * theta[None, :]
        pe = jnp.concatenate([jnp.sin(ang), jnp.cos(ang)], axis=-1)
        return x.astype(jnp.float32) + (pe @ w.T)[None]

    def make_inputs(key, b, n, d, dtype):
        kx, kw = jax.random.split(key)
        x = jax.random.normal(kx, (b, n, d), dtype=jnp.float32).astype(dtype)
        bound = 1.0 / (d ** 0.5)
        w = jax.random.uniform(kw, (d, d), minval=-bound, maxval=bound,
                               dtype=jnp.float32)
        theta = 10000.0 ** (-2.0 / d * jnp.arange(d // 2, dtype=jnp.float32))
        return x, w, theta

    k1, k2, k3 = jax.random.split(jax.random.PRNGKey(0), 3)

    # --- Case 1: small D (split-K path), f32 end-to-end, tight tolerance ----
    x1, w1, t1 = make_inputs(k1, 2, 8, 32, jnp.float32)
    out1 = jax.block_until_ready(mlp_pe(x1, w1, t1, offset=3,
                                        use_bf16_mxu=False))
    ref1 = reference(x1, w1, t1, 3)
    assert jnp.allclose(out1, ref1, atol=1e-5, rtol=1e-5), "case1 f32 mismatch"

    # Same inputs through the default bf16-MXU path (looser tolerance).
    out1b = jax.block_until_ready(mlp_pe(x1, w1, t1, offset=3))
    assert jnp.allclose(out1b, ref1, atol=3e-2, rtol=3e-2), "case1 bf16 mismatch"

    # --- Case 2: D=256 -> full-K fused path, 2 seq tiles incl. ragged tile --
    x2, w2, t2 = make_inputs(k2, 2, 24, 256, jnp.float32)
    out2 = jax.block_until_ready(mlp_pe(x2, w2, t2, offset=5,
                                        use_bf16_mxu=False))
    ref2 = reference(x2, w2, t2, 5)
    assert jnp.allclose(out2, ref2, atol=1e-3, rtol=1e-3), "case2 mismatch"

    # --- Case 3: bf16 activations -> bf16 residual-add path -----------------
    x3, w3, t3 = make_inputs(k3, 2, 16, 32, jnp.bfloat16)
    out3 = jax.block_until_ready(mlp_pe(x3, w3, t3, offset=0))
    ref3 = reference(x3, w3, t3, 0)
    assert jnp.allclose(out3.astype(jnp.float32), ref3,
                        atol=1e-1, rtol=5e-2), "case3 bf16 mismatch"

    print("KERNEL_OK")
</pallas_src>

<mosaic_0001>
module attributes {stable_mosaic.version = 11 : i64} {
  func.func @_mlp_pe_kernel_splitk(%arg0: i32, %arg1: i32, %arg2: memref<1xi32, #tpu.memory_space<smem>>, %arg3: memref<2x8x32xf32, #tpu.memory_space<vmem>>, %arg4: memref<1x16xf32, #tpu.memory_space<vmem>>, %arg5: memref<16x32xf32, #tpu.memory_space<vmem>>, %arg6: memref<16x32xf32, #tpu.memory_space<vmem>>, %arg7: memref<2x8x32xf32, #tpu.memory_space<vmem>>) attributes {dimension_semantics = [#tpu.dimension_semantics<parallel>, #tpu.dimension_semantics<parallel>], iteration_bounds = array<i64: 1, 1>, scalar_prefetch = 1 : i64, scratch_operands = 0 : i64, tpu.core_type = #tpu.core_type<tc>, window_params = [{transform_indices = @transform_0, window_bounds = array<i64: 2, 8, 32>}, {pipeline_mode = #tpu.pipeline_mode<synchronous>, transform_indices = @transform_1, window_bounds = array<i64: 1, 16>}, {pipeline_mode = #tpu.pipeline_mode<synchronous>, transform_indices = @transform_2, window_bounds = array<i64: 16, 32>}, {pipeline_mode = #tpu.pipeline_mode<synchronous>, transform_indices = @transform_3, window_bounds = array<i64: 16, 32>}, {transform_indices = @transform_4, window_bounds = array<i64: 2, 8, 32>}]} {
    %c8_i32 = arith.constant 8 : i32
    %0 = arith.muli %arg1, %c8_i32 : i32
    %c0 = arith.constant 0 : index
    %1 = memref.load %arg2[%c0] : memref<1xi32, #tpu.memory_space<smem>>
    %2 = arith.addi %0, %1 : i32
    %3 = tpu.iota {dimensions = array<i32: 0>} : vector<8x16xi32>
    %4 = vector.broadcast %2 : i32 to vector<8x16xi32>
    %5 = arith.addi %3, %4 : vector<8x16xi32>
    %6 = arith.sitofp %5 : vector<8x16xi32> to vector<8x16xf32>
    %c0_0 = arith.constant 0 : index
    %c0_1 = arith.constant 0 : index
    %7 = vector.load %arg4[%c0_0, %c0_1] : memref<1x16xf32, #tpu.memory_space<vmem>>, vector<1x16xf32>
    %8 = vector.broadcast %7 : vector<1x16xf32> to vector<8x16xf32>
    %9 = arith.mulf %6, %8 : vector<8x16xf32>
    %10 = math.sin %9 : vector<8x16xf32>
    %11 = math.cos %9 : vector<8x16xf32>
    %c0_2 = arith.constant 0 : index
    %c0_3 = arith.constant 0 : index
    %12 = vector.load %arg5[%c0_2, %c0_3] : memref<16x32xf32, #tpu.memory_space<vmem>>, vector<16x32xf32>
    %cst = arith.constant dense<0.000000e+00> : vector<8x32xf32>
    %13 = tpu.matmul %10, %12, %cst {dimension_numbers = #tpu.dot_dimension_numbers<[1], [0], [0], [1], [0, 0, 1, 1], [], []>} : vector<8x16xf32>, vector<16x32xf32>, vector<8x32xf32> -> vector<8x32xf32>
    %c0_4 = arith.constant 0 : index
    %c0_5 = arith.constant 0 : index
    %14 = vector.load %arg6[%c0_4, %c0_5] : memref<16x32xf32, #tpu.memory_space<vmem>>, vector<16x32xf32>
    %cst_6 = arith.constant dense<0.000000e+00> : vector<8x32xf32>
    %15 = tpu.matmul %11, %14, %cst_6 {dimension_numbers = #tpu.dot_dimension_numbers<[1], [0], [0], [1], [0, 0, 1, 1], [], []>} : vector<8x16xf32>, vector<16x32xf32>, vector<8x32xf32> -> vector<8x32xf32>
    %16 = arith.addf %13, %15 : vector<8x32xf32>
    %c0_7 = arith.constant 0 : index
    %c0_8 = arith.constant 0 : index
    %c0_9 = arith.constant 0 : index
    %17 = vector.load %arg3[%c0_7, %c0_8, %c0_9] : memref<2x8x32xf32, #tpu.memory_space<vmem>>, vector<2x8x32xf32>
    %18 = vector.shape_cast %16 : vector<8x32xf32> to vector<1x8x32xf32>
    %19 = vector.broadcast %18 : vector<1x8x32xf32> to vector<2x8x32xf32>
    %20 = arith.addf %17, %19 : vector<2x8x32xf32>
    %c0_10 = arith.constant 0 : index
    %c0_11 = arith.constant 0 : index
    %c0_12 = arith.constant 0 : index
    %21 = vector.load %arg7[%c0_10, %c0_11, %c0_12] : memref<2x8x32xf32, #tpu.memory_space<vmem>>, vector<2x8x32xf32>
    tpu.vector_store %arg7[%c0_10, %c0_11, %c0_12], %20 {strides = array<i32>} : memref<2x8x32xf32, #tpu.memory_space<vmem>>, vector<2x8x32xf32>,
    return
  }
  func.func @transform_0(%arg0: i32, %arg1: i32, %arg2: memref<1xi32, #tpu.memory_space<smem>>) -> (i32, i32, i32) {
    %c0_i32 = arith.constant 0 : i32
    %c0_i32_0 = arith.constant 0 : i32
    return %arg0, %arg1, %c0_i32 : i32, i32, i32
  }
  func.func @transform_1(%arg0: i32, %arg1: i32, %arg2: memref<1xi32, #tpu.memory_space<smem>>) -> (i32, i32) {
    %c0_i32 = arith.constant 0 : i32
    %c0_i32_0 = arith.constant 0 : i32
    %c0_i32_1 = arith.constant 0 : i32
    return %c0_i32, %c0_i32_0 : i32, i32
  }
  func.func @transform_2(%arg0: i32, %arg1: i32, %arg2: memref<1xi32, #tpu.memory_space<smem>>) -> (i32, i32) {
    %c0_i32 = arith.constant 0 : i32
    %c0_i32_0 = arith.constant 0 : i32
    %c0_i32_1 = arith.constant 0 : i32
    return %c0_i32, %c0_i32_0 : i32, i32
  }
  func.func @transform_3(%arg0: i32, %arg1: i32, %arg2: memref<1xi32, #tpu.memory_space<smem>>) -> (i32, i32) {
    %c0_i32 = arith.constant 0 : i32
    %c0_i32_0 = arith.constant 0 : i32
    %c0_i32_1 = arith.constant 0 : i32
    return %c0_i32, %c0_i32_0 : i32, i32
  }
  func.func @transform_4(%arg0: i32, %arg1: i32, %arg2: memref<1xi32, #tpu.memory_space<smem>>) -> (i32, i32, i32) {
    %c0_i32 = arith.constant 0 : i32
    %c0_i32_0 = arith.constant 0 : i32
    return %arg0, %arg1, %c0_i32 : i32, i32, i32
  }
}

module attributes {stable_mosaic.version = 11 : i64} {
  func.func @_mlp_pe_kernel_splitk(%arg0: i32, %arg1: i32, %arg2: memref<1xi32, #tpu.memory_space<smem>>, %arg3: memref<2x8x32xf32, #tpu.memory_space<vmem>>, %arg4: memref<1x16xf32, #tpu.memory_space<vmem>>, %arg5: memref<16x32xf32, #tpu.memory_space<vmem>>, %arg6: memref<16x32xf32, #tpu.memory_space<vmem>>, %arg7: memref<2x8x32xf32, #tpu.memory_space<vmem>>) attributes {dimension_semantics = [#tpu.dimension_semantics<parallel>, #tpu.dimension_semantics<parallel>], iteration_bounds = array<i64: 1, 1>, scalar_prefetch = 1 : i64, scratch_operands = 0 : i64, tpu.core_type = #tpu.core_type<tc>, window_params = [{transform_indices = @transform_0, window_bounds = array<i64: 2, 8, 32>}, {pipeline_mode = #tpu.pipeline_mode<synchronous>, transform_indices = @transform_1, window_bounds = array<i64: 1, 16>}, {pipeline_mode = #tpu.pipeline_mode<synchronous>, transform_indices = @transform_2, window_bounds = array<i64: 16, 32>}, {pipeline_mode = #tpu.pipeline_mode<synchronous>, transform_indices = @transform_3, window_bounds = array<i64: 16, 32>}, {transform_indices = @transform_4, window_bounds = array<i64: 2, 8, 32>}]} {
    %c8_i32 = arith.constant 8 : i32
    %0 = arith.muli %arg1, %c8_i32 : i32
    %c0 = arith.constant 0 : index
    %1 = memref.load %arg2[%c0] : memref<1xi32, #tpu.memory_space<smem>>
    %2 = arith.addi %0, %1 : i32
    %3 = tpu.iota {dimensions = array<i32: 0>} : vector<8x16xi32>
    %4 = vector.broadcast %2 : i32 to vector<8x16xi32>
    %5 = arith.addi %3, %4 : vector<8x16xi32>
    %6 = arith.sitofp %5 : vector<8x16xi32> to vector<8x16xf32>
    %c0_0 = arith.constant 0 : index
    %c0_1 = arith.constant 0 : index
    %7 = vector.load %arg4[%c0_0, %c0_1] : memref<1x16xf32, #tpu.memory_space<vmem>>, vector<1x16xf32>
    %8 = vector.broadcast %7 : vector<1x16xf32> to vector<8x16xf32>
    %9 = arith.mulf %6, %8 : vector<8x16xf32>
    %10 = math.sin %9 : vector<8x16xf32>
    %11 = math.cos %9 : vector<8x16xf32>
    %c0_2 = arith.constant 0 : index
    %c0_3 = arith.constant 0 : index
    %12 = vector.load %arg5[%c0_2, %c0_3] : memref<16x32xf32, #tpu.memory_space<vmem>>, vector<16x32xf32>
    %cst = arith.constant dense<0.000000e+00> : vector<8x32xf32>
    %13 = tpu.matmul %10, %12, %cst {dimension_numbers = #tpu.dot_dimension_numbers<[1], [0], [0], [1], [0, 0, 1, 1], [], []>} : vector<8x16xf32>, vector<16x32xf32>, vector<8x32xf32> -> vector<8x32xf32>
    %c0_4 = arith.constant 0 : index
    %c0_5 = arith.constant 0 : index
    %14 = vector.load %arg6[%c0_4, %c0_5] : memref<16x32xf32, #tpu.memory_space<vmem>>, vector<16x32xf32>
    %cst_6 = arith.constant dense<0.000000e+00> : vector<8x32xf32>
    %15 = tpu.matmul %11, %14, %cst_6 {dimension_numbers = #tpu.dot_dimension_numbers<[1], [0], [0], [1], [0, 0, 1, 1], [], []>} : vector<8x16xf32>, vector<16x32xf32>, vector<8x32xf32> -> vector<8x32xf32>
    %16 = arith.addf %13, %15 : vector<8x32xf32>
    %c0_7 = arith.constant 0 : index
    %c0_8 = arith.constant 0 : index
    %c0_9 = arith.constant 0 : index
    %17 = vector.load %arg3[%c0_7, %c0_8, %c0_9] : memref<2x8x32xf32, #tpu.memory_space<vmem>>, vector<2x8x32xf32>
    %18 = vector.shape_cast %16 : vector<8x32xf32> to vector<1x8x32xf32>
    %19 = vector.broadcast %18 : vector<1x8x32xf32> to vector<2x8x32xf32>
    %20 = arith.addf %17, %19 : vector<2x8x32xf32>
    %c0_10 = arith.constant 0 : index
    %c0_11 = arith.constant 0 : index
    %c0_12 = arith.constant 0 : index
    %21 = vector.load %arg7[%c0_10, %c0_11, %c0_12] : memref<2x8x32xf32, #tpu.memory_space<vmem>>, vector<2x8x32xf32>
    tpu.vector_store %arg7[%c0_10, %c0_11, %c0_12], %20 {strides = array<i32>} : memref<2x8x32xf32, #tpu.memory_space<vmem>>, vector<2x8x32xf32>,
    return
  }
  func.func @transform_0(%arg0: i32, %arg1: i32, %arg2: memref<1xi32, #tpu.memory_space<smem>>) -> (i32, i32, i32) {
    %c0_i32 = arith.constant 0 : i32
    %c0_i32_0 = arith.constant 0 : i32
    return %arg0, %arg1, %c0_i32 : i32, i32, i32
  }
  func.func @transform_1(%arg0: i32, %arg1: i32, %arg2: memref<1xi32, #tpu.memory_space<smem>>) -> (i32, i32) {
    %c0_i32 = arith.constant 0 : i32
    %c0_i32_0 = arith.constant 0 : i32
    %c0_i32_1 = arith.constant 0 : i32
    return %c0_i32, %c0_i32_0 : i32, i32
  }
  func.func @transform_2(%arg0: i32, %arg1: i32, %arg2: memref<1xi32, #tpu.memory_space<smem>>) -> (i32, i32) {
    %c0_i32 = arith.constant 0 : i32
    %c0_i32_0 = arith.constant 0 : i32
    %c0_i32_1 = arith.constant 0 : i32
    return %c0_i32, %c0_i32_0 : i32, i32
  }
  func.func @transform_3(%arg0: i32, %arg1: i32, %arg2: memref<1xi32, #tpu.memory_space<smem>>) -> (i32, i32) {
    %c0_i32 = arith.constant 0 : i32
    %c0_i32_0 = arith.constant 0 : i32
    %c0_i32_1 = arith.constant 0 : i32
    return %c0_i32, %c0_i32_0 : i32, i32
  }
  func.func @transform_4(%arg0: i32, %arg1: i32, %arg2: memref<1xi32, #tpu.memory_space<smem>>) -> (i32, i32, i32) {
    %c0_i32 = arith.constant 0 : i32
    %c0_i32_0 = arith.constant 0 : i32
    return %arg0, %arg1, %c0_i32 : i32, i32, i32
  }
}

</mosaic_0001>

<bundles_post_ra>
// kernel: tpu_custom_call.1
= control target key start
LH: loop header
LB: loop body
LE: loop exit
PB: predicated region body
PF: predicated region fallthrough
CT: control target
= control target key end

     0   :  { %11 = vsyncpa [#allocation5], 0  ;;  %s754_s0 = inlined_call_operand.<no memory space> [shape: s32[1], index: 0, kind: input, shape index: {}]   ;;  %s755_s1 = inlined_call_operand.hbm [shape: f32[2,8,32], index: 1, kind: input, shape index: {}]   ;;  %s756_s2 = inlined_call_operand.vmem [shape: f32[1,16], index: 2, kind: input, shape index: {}]   ;;  %s757_s3 = inlined_call_operand.hbm [shape: f32[16,32], index: 3, kind: input, shape index: {}]   ;;  %s758_s4 = inlined_call_operand.hbm [shape: f32[16,32], index: 4, kind: input, shape index: {}]   ;;  %s759_s5 = inlined_call_operand.hbm [shape: f32[2,8,32], index: 5, kind: output, shape index: {}]  }
   0x1   :  { %12 = vsyncpa [#allocation8], 0 }
   0x2   :  { %13 = vsyncpa [#allocation6], 0  ;;  %s615_s18 = smov [#allocation7]   ;;  %s616_s20 = smov [#allocation4]  }
   0x3   :  { %s33_s19 = sshll.u32 %s615_s18, 4  ;;  %s19_s21 = sshll.u32 %s616_s20, 4  ;;  %s34_s19 = int_to_ptr.vmem [resolvable:$true] %s33_s19  ;;  %s660_s21 = int_to_ptr.vmem [resolvable:$true] %s19_s21 }
   0x4   :  { %s521_s24 = scalar_lea.hbm %s757_s3, 256 }
   0x5   :  { %p522_p0 = scmp.ne.s32.totalorder %s757_s3, %s521_s24  ;;  %p525_p1 = scmp.lt.u32.totalorder %s521_s24, %s757_s3 }
   0x7   :  { %p527_p2 = pnand %p525_p1, %p522_p0 }
   0x9   :  { %530 = shalt.err (!%p527_p2)
}
   0xa   :  { %s531_s29 = scalar_lea.vmem %s34_s19, 256  ;;  %p536_p4 = scmp.lt.s32.totalorder %s34_s19, %s34_s19 }
   0xb   :  { %p532_p3 = scmp.ne.s32.totalorder %s34_s19, %s531_s29  ;;  %p537_p5 = scmp.lt.s32.totalorder %s531_s29, %s531_s29 }
   0xd   :  { %p538_p6 = por %p537_p5, %p536_p4 }
   0xf   :  { %p539_p7 = pnand %p538_p6, %p532_p3 }
  0x11   :  { %542 = shalt.err (!%p539_p7)
}
  0x12   :  { %s617_s30 = smov 128   ;;  %s618_s6 = smov 8  }
  0x13   :  { %39 = dma.hbm_to_vmem [thread:$0]  %s757_s3, 256, %s34_s19, [#allocation8], %s617_s30, %s617_s30, %s618_s6  }
  0x14   :  { %s543_s11 = scalar_lea.hbm %s755_s1, 256 }
  0x15   :  { %p544_p8 = scmp.ne.s32.totalorder %s755_s1, %s543_s11  ;;  %p547_p9 = scmp.lt.u32.totalorder %s543_s11, %s755_s1 }
  0x17   :  { %p549_p10 = pnand %p547_p9, %p544_p8 }
  0x19   :  { %552 = shalt.err (!%p549_p10)
}
  0x1a   :  { %s553_s16 = scalar_lea.vmem %s660_s21, 256  ;;  %p558_p12 = scmp.lt.s32.totalorder %s660_s21, %s660_s21 }
  0x1b   :  { %p554_p11 = scmp.ne.s32.totalorder %s660_s21, %s553_s16  ;;  %p559_p13 = scmp.lt.s32.totalorder %s553_s16, %s553_s16 }
  0x1d   :  { %p560_p0 = por %p559_p13, %p558_p12 }
  0x1f   :  { %p561_p1 = pnand %p560_p0, %p554_p11 }
  0x21   :  { %564 = shalt.err (!%p561_p1)
}
  0x22   :  { %25 = dma.hbm_to_vmem [thread:$0]  %s755_s1, 256, %s660_s21, [#allocation5], %s617_s30, %s617_s30, %s618_s6  }
  0x23   :  { %s619_s18 = smov [#allocation9]   ;;  %s565_s23 = scalar_lea.hbm %s758_s4, 256 }
  0x24   :  { %s45_s19 = sshll.u32 %s619_s18, 4  ;;  %p566_p2 = scmp.ne.s32.totalorder %s758_s4, %s565_s23  ;;  %s46_s19 = int_to_ptr.vmem [resolvable:$true] %s45_s19 }
  0x25   :  { %p569_p3 = scmp.lt.u32.totalorder %s565_s23, %s758_s4 }
  0x27   :  { %p571_p4 = pnand %p569_p3, %p566_p2 }
  0x29   :  { %574 = shalt.err (!%p571_p4)
}
  0x2a   :  { %s575_s28 = scalar_lea.vmem %s46_s19, 256  ;;  %p580_p6 = scmp.lt.s32.totalorder %s46_s19, %s46_s19 }
  0x2b   :  { %p576_p5 = scmp.ne.s32.totalorder %s46_s19, %s575_s28  ;;  %p581_p7 = scmp.lt.s32.totalorder %s575_s28, %s575_s28 }
  0x2d   :  { %p582_p8 = por %p581_p7, %p580_p6 }
  0x2f   :  { %p583_p9 = pnand %p582_p8, %p576_p5 }
  0x31   :  { %586 = shalt.err (!%p583_p9)
}
  0x32   :  { %51 = dma.hbm_to_vmem [thread:$0]  %s758_s4, 256, %s46_s19, [#allocation8], %s617_s30, %s617_s30, %s618_s6  }
  0x33   :  { %609 = dma.done.wait [#allocation5], 256  }
  0x34   :  { %610 = vsyncadd [#allocation5], 4294967040 }
  0x35   :  { %611 = dma.done.wait [#allocation8], 512  }
  0x36   :  { %612 = vsyncadd [#allocation8], 4294966784  ;;  %v64_v0 = vlaneseq  ;;  %v620_v1 = vmov 0.0|0.0   ;;  %v66_v2 = vstv %s754_s0  ;;  %vm621_vm0 = vmmov 0   ;;  %v286_v7 = vld [vmem:[#allocation9] sm:$0xff]  ;;  %v287_v8 = vld [vmem:[#allocation9 + $0x8] sm:$0xff] }
  0x37   :  { %491 = vmatprep.subr.bf16.mxu1 %v620_v1  ;;  %494 = vmatprep.subr.bf16.mxu0 %v620_v1  ;;  %v622_v3 = vmov 0.0   ;;  %v284_v9 = vld [vmem:[#allocation7] sm:$0xff]  ;;  %v492_v10 = vpack.c.bf16 %v287_v8, %v286_v7  ;;  %v285_v11 = vld [vmem:[#allocation7 + $0x8] sm:$0xff]  ;;  %v460_v12 = vld [vmem:[%s756_s2] ss:$0 sm:$0xff]  ;;  %s629_s0 = smov [#allocation10]  }
  0x38   :  { %481 = vmatprep.mubr.msk.f32.mxu1 %vm621_vm0, %v622_v3  ;;  %488 = vmatprep.mubr.msk.f32.mxu0 %vm621_vm0, %v622_v3  ;;  %v65_v4 = vshrl.u32 %v64_v0, 7  ;;  %v495_v13 = vpack.c.bf16 %v285_v11, %v284_v9  ;;  %v623_v26 = vmov 683565275   ;;  %v624_v28 = vmov 2475754826   ;;  %s447_s2 = sshll.u32 %s629_s0, 4  ;;  %s448_s2 = int_to_ptr.vmem [resolvable:$true] %s447_s2 }
  0x39   :  { %493 = vmatpush3.bf16.msra.mxu1 %v492_v10  ;;  %v625_v30 = vmov 2131351028   ;;  %v626_v32 = vmov 2102212464   ;;  %v627_v34 = vmov 920167782   ;;  %p592_p11 = scmp.lt.s32.totalorder %s448_s2, %s448_s2 }
  0x3a   :  { %v67_v5 = vadd.s32 %v66_v2, %v65_v4  ;;  %496 = vmatpush3.bf16.msra.mxu0 %v495_v13  ;;  %v628_v41 = vmov 1326507024   ;;  %s587_s9 = scalar_lea.vmem %s448_s2, 256 }
  0x3b   :  { %p588_p10 = scmp.ne.s32.totalorder %s448_s2, %s587_s9  ;;  %p593_p12 = scmp.lt.s32.totalorder %s587_s9, %s587_s9 }
  0x3c   :  { %v68_v6 = vcvt.s32.f32 %v67_v5 }
  0x3d   :  { %p594_p13 = por %p593_p12, %p592_p11 }
  0x3e   :  { %v718_v14 = vmul.f32 %v460_v12, %v68_v6 }
  0x3f   :  { %p595_p0 = pnand %p594_p13, %p588_p10 }
  0x40   :  { %v80_v15 = vand.u32 2139095040, %v718_v14  ;;  %v77_v17 = vand.u32 2147483647, %v718_v14  ;;  %vm79_vm8 = vcmp.lt.s32.totalorder %v718_v14, 0  ;;  %vm169_vm0 = vweird.f32 %v718_v14 }
  0x42   :  { %v81_v16 = vshrl.u32 %v80_v15, 23  ;;  %v84_v20 = vand.u32 8388607, %v77_v17  ;;  %vm78_vm9 = vcmp.le.f32.partialorder %v77_v17, 0.7853982 }
  0x44   :  { %v461_v18 = vadd.s32 4294967169, %v81_v16  ;;  %v85_v23 = vor.u32 8388608, %v84_v20 }
  0x46   :  { %v87_v19 = vadd.s32 1, %v461_v18  ;;  %v125_v43 = vshll.u32 %v85_v23, 8 }
  0x48   :  { %vm88_vm1 = vcmp.gt.s32.totalorder %v87_v19, 0 }
  0x49   :  { %v89_v21 = vsel %vm88_vm1, %v87_v19, 0  ;;  %vm288_vm1 = vcmask 130048  }
  0x4a   :  { %v91_v22 = vand.u32 31, %v89_v21  ;;  %v90_v24 = vshrl.u32 %v89_v21, 5 }
  0x4c   :  { %v92_v25 = vsub.s32 32, %v91_v22  ;;  %v94_v27 = vshll.u32 %v623_v26, %v91_v22  ;;  %v97_v29 = vshll.u32 %v624_v28, %v91_v22  ;;  %v100_v31 = vshll.u32 %v625_v30, %v91_v22 }
  0x4d   :  { %v103_v33 = vshll.u32 %v626_v32, %v91_v22  ;;  %v106_v35 = vshll.u32 %v627_v34, %v91_v22  ;;  %vm109_vm2 = vcmp.lt.s32.totalorder %v90_v24, 1  ;;  %vm112_vm3 = vcmp.lt.s32.totalorder %v90_v24, 4 }
  0x4e   :  { %v93_v36 = vshrl.u32 %v623_v26, %v92_v25  ;;  %v95_v37 = vshrl.u32 %v624_v28, %v92_v25  ;;  %v98_v38 = vshrl.u32 %v625_v30, %v92_v25  ;;  %v101_v39 = vshrl.u32 %v626_v32, %v92_v25 }
  0x4f   :  { %v104_v40 = vshrl.u32 %v627_v34, %v92_v25  ;;  %v107_v42 = vshrl.u32 %v628_v41, %v92_v25  ;;  %vm110_vm4 = vcmp.lt.s32.totalorder %v90_v24, 2  ;;  %vm111_vm5 = vcmp.lt.s32.totalorder %v90_v24, 3 }
  0x50   :  { %v96_v44 = vor.u32 %v95_v37, %v94_v27  ;;  %v99_v45 = vor.u32 %v98_v38, %v97_v29  ;;  %v102_v46 = vor.u32 %v101_v39, %v100_v31 }
  0x51   :  { %v105_v47 = vor.u32 %v104_v40, %v103_v33  ;;  %v108_v48 = vor.u32 %v107_v42, %v106_v35 }
  0x52   :  { %v113_v49 = vsel %vm109_vm2, %v93_v36, %v96_v44  ;;  %v114_v50 = vsel %vm112_vm3, %v102_v46, 2102212464  ;;  %v117_v51 = vsel %vm109_vm2, %v96_v44, %v99_v45  ;;  %v121_v52 = vsel %vm109_vm2, %v99_v45, %v102_v46 }
  0x53   :  { %v115_v53 = vsel %vm111_vm5, %v99_v45, %v114_v50  ;;  %v118_v54 = vsel %vm112_vm3, %v105_v47, 920167782  ;;  %v122_v55 = vsel %vm112_vm3, %v108_v48, 1326507024  ;;  %v435_v50 = vld [vmem:[#allocation4] sm:$0xff]  ;;  %vm439_vm2 = vcmask 261120  }
  0x54   :  { %v119_v56 = vsel %vm111_vm5, %v102_v46, %v118_v54  ;;  %v123_v57 = vsel %vm111_vm5, %v105_v47, %v122_v55  ;;  %v116_v58 = vsel %vm110_vm4, %v113_v49, %v115_v53 }
  0x55   :  { %v120_v59 = vsel %vm110_vm4, %v117_v51, %v119_v56  ;;  %v124_v60 = vsel %vm110_vm4, %v121_v52, %v123_v57  ;;  %v132_v1 = vmul.u32 %v125_v43, %v116_v58  ;;  %v436_v51 = vld [vmem:[#allocation4 + $0x8] sm:$0xff] }
  0x56   :  { %v724_v61 = vmul.u32.u64.low %v125_v43, %v124_v60  ;;  %v725_v62 = vmul.u32.u64.high %v125_v43, %v124_v60, %v724_v61  ;;  %v727_v63 = vmul.u32.u64.low %v125_v43, %v120_v59  ;;  %v728_v0 = vmul.u32.u64.high %v125_v43, %v120_v59, %v727_v63 }
  0x58   :  { %vm134_vm6 = vc.u32 %v725_v62, %v727_v63  ;;  %v135_v2 = vadd.s32 1, %v728_v0  ;;  %v133_v13 = vadd.s32 %v727_v63, %v725_v62 }
  0x5a   :  { %v136_v3 = vsel %vm134_vm6, %v135_v2, %v728_v0 }
  0x5b   :  { %v137_v4 = vadd.s32 %v136_v3, %v132_v1 }
  0x5d   :  { %v138_v5 = vadd.s32 536870912, %v137_v4 }
  0x5f   :  { %v139_v6 = vshrl.u32 %v138_v5, 30 }
  0x61   :  { %v140_v7 = vshll.u32 %v139_v6, 30  ;;  %v163_v27 = vsub.s32 4, %v139_v6 }
  0x63   :  { %v141_v8 = vsub.s32 %v137_v4, %v140_v7  ;;  %v164_v30 = vsel %vm79_vm8, %v163_v27, %v139_v6 }
  0x64   :  { %v166_v33 = vsel %vm78_vm9, 0, %v164_v30 }
  0x65   :  { %v143_v9 = vsub.s32 0, %v141_v8  ;;  %v170_v34 = vadd.s32 3, %v166_v33  ;;  %v274_v35 = vand.u32 3, %v166_v33 }
  0x67   :  { %v462_v10 = vmin.u32 %v143_v9, %v141_v8  ;;  %v171_v36 = vand.u32 3, %v170_v34  ;;  %vm279_vm10 = vcmp.eq.s32.totalorder %v274_v35, 2  ;;  %vm276_vm12 = vcmp.eq.s32.totalorder %v274_v35, 0 }
  0x68   :  { %vm275_vm14 = vcmp.lt.s32.totalorder %v274_v35, 2 }
  0x69   :  { %v145_v11 = vclz %v462_v10  ;;  %vm176_vm11 = vcmp.eq.s32.totalorder %v171_v36, 2  ;;  %vm173_vm13 = vcmp.eq.s32.totalorder %v171_v36, 0  ;;  %vm172_vm15 = vcmp.lt.s32.totalorder %v171_v36, 2 }
  0x6b   :  { %v463_v12 = vadd.s32 4294967294, %v145_v11 }
  0x6d   :  { %vm464_vm7 = vcmp.lt.s32.totalorder %v463_v12, 0 }
  0x6e   :  { %v148_v15 = vsel %vm464_vm7, 0, %v463_v12 }
  0x6f   :  { %v149_v16 = vsub.s32 32, %v148_v15  ;;  %v150_v18 = vshll.u32 %v141_v8, %v148_v15  ;;  %v153_v19 = vsub.s32 4294967266, %v148_v15 }
  0x71   :  { %v151_v20 = vshrl.u32 %v133_v13, %v149_v16  ;;  %v154_v21 = vadd.s32 127, %v153_v19 }
  0x73   :  { %v152_v22 = vor.u32 %v151_v20, %v150_v18  ;;  %v155_v23 = vshll.u32 %v154_v21, 23 }
  0x75   :  { %v156_v24 = vor.u32 4788187, %v155_v23  ;;  %v159_v25 = vcvt.s32.f32 %v152_v22 }
  0x77   :  { %v157_v26 = vand.u32 2147483647, %v156_v24 }
  0x79   :  { %v160_v28 = vmul.f32 %v159_v25, %v157_v26 }
  0x7b   :  { %v161_v29 = vxor.u32 2147483648, %v160_v28 }
  0x7d   :  { %v162_v31 = vsel %vm79_vm8, %v161_v29, %v160_v28 }
  0x7e   :  { %v165_v32 = vsel %vm78_vm9, %v718_v14, %v162_v31 }
  0x7f   :  { %517 = vcosq.f32 %v165_v32 }
  0x80   :  { %519 = vsinq.f32 %v165_v32 }
  0x89   :  { %v518_v37 = vpop.eup %517 }
  0x8a   :  { %v520_v38 = vpop.eup %519  ;;  %v177_v39 = vxor.u32 2147483648, %v518_v37 }
  0x8b   :  { %v174_v40 = vxor.u32 2147483648, %v520_v38 }
  0x8c   :  { %v281_v17 = vsel %vm279_vm10, %v177_v39, %v520_v38  ;;  %v178_v41 = vsel %vm176_vm11, %v177_v39, %v520_v38 }
  0x8d   :  { %v278_v42 = vsel %vm276_vm12, %v518_v37, %v174_v40  ;;  %v175_v43 = vsel %vm173_vm13, %v518_v37, %v174_v40 }
  0x8e   :  { %v282_v44 = vsel %vm275_vm14, %v278_v42, %v281_v17  ;;  %v179_v45 = vsel %vm172_vm15, %v175_v43, %v178_v41 }
  0x8f   :  { %v283_v46 = vsel %vm169_vm0, nan, %v282_v44  ;;  %v180_v47 = vsel %vm169_vm0, nan, %v179_v45 }
  0x90   :  { %482 = vmatmul.mubr.msk.f32.vlgmr.msra.gmra.mrb[0].mxu1 %vm288_vm1, %v283_v46  ;;  %489 = vmatmul.mubr.msk.f32.vlgmr.msra.gmra.mrb[0].mxu0 %vm288_vm1, %v180_v47 }
 0x163   :  { %v358_v48 = vpop.f32.mrb[0].mxu1  ;;  %v431_v49 = vpop.f32.mrb[0].mxu0 }
 0x164   :  { %v432_v52 = vadd.f32 %v431_v49, %v358_v48  ;;  %v483_v53 = vpop.f32.mrb[1].mxu1  ;;  %v490_v14 = vpop.f32.mrb[1].mxu0 }
 0x166   :  { %v437_v54 = vadd.f32 %v435_v50, %v432_v52  ;;  %v438_v55 = vadd.f32 %v436_v51, %v432_v52 }
 0x168   :  { %440 = vst.msk [vmem:[#allocation10] sm:$0xff] %vm439_vm2, %v437_v54  ;;  %441 = vst.msk [vmem:[#allocation10 + $0x8] sm:$0xff] %vm439_vm2, %v438_v55 }
 0x169   :  { %598 = shalt.err (!%p595_p0)
}
 0x16a   :  { %s599_s12 = scalar_lea.hbm %s759_s5, 256 }
 0x16b   :  { %p600_p1 = scmp.ne.s32.totalorder %s759_s5, %s599_s12  ;;  %p603_p2 = scmp.lt.u32.totalorder %s599_s12, %s759_s5 }
 0x16d   :  { %p605_p3 = pnand %p603_p2, %p600_p1 }
 0x16f   :  { %608 = shalt.err (!%p605_p3)
}
 0x170   :  { %453 = dma.vmem_to_hbm [thread:$0]  %s448_s2, 256, %s759_s5, [#allocation6], %s617_s30, %s617_s30, %s618_s6  }
 0x171   :  { %613 = dma.done.wait [#allocation6], 256  }
 0x172   :  { %614 = vsyncadd [#allocation6], 4294967040 }
 0x173   :  { %457 = vsyncpa [#allocation5], 1 }
 0x174   :  { %458 = vsyncpa [#allocation8], 1 }
 0x175   :  { %459 = vsyncpa [#allocation6], 1 }

// kernel: tpu_custom_call.1
= control target key start
LH: loop header
LB: loop body
LE: loop exit
PB: predicated region body
PF: predicated region fallthrough
CT: control target
= control target key end

     0   :  { %11 = vsyncpa [#allocation5], 0  ;;  %s754_s0 = inlined_call_operand.<no memory space> [shape: s32[1], index: 0, kind: input, shape index: {}]   ;;  %s755_s1 = inlined_call_operand.hbm [shape: f32[2,8,32], index: 1, kind: input, shape index: {}]   ;;  %s756_s2 = inlined_call_operand.vmem [shape: f32[1,16], index: 2, kind: input, shape index: {}]   ;;  %s757_s3 = inlined_call_operand.hbm [shape: f32[16,32], index: 3, kind: input, shape index: {}]   ;;  %s758_s4 = inlined_call_operand.hbm [shape: f32[16,32], index: 4, kind: input, shape index: {}]   ;;  %s759_s5 = inlined_call_operand.hbm [shape: f32[2,8,32], index: 5, kind: output, shape index: {}]  }
   0x1   :  { %12 = vsyncpa [#allocation8], 0 }
   0x2   :  { %13 = vsyncpa [#allocation6], 0  ;;  %s615_s18 = smov [#allocation7]   ;;  %s616_s20 = smov [#allocation4]  }
   0x3   :  { %s33_s19 = sshll.u32 %s615_s18, 4  ;;  %s19_s21 = sshll.u32 %s616_s20, 4  ;;  %s34_s19 = int_to_ptr.vmem [resolvable:$true] %s33_s19  ;;  %s660_s21 = int_to_ptr.vmem [resolvable:$true] %s19_s21 }
   0x4   :  { %s521_s24 = scalar_lea.hbm %s757_s3, 256 }
   0x5   :  { %p522_p0 = scmp.ne.s32.totalorder %s757_s3, %s521_s24  ;;  %p525_p1 = scmp.lt.u32.totalorder %s521_s24, %s757_s3 }
   0x7   :  { %p527_p2 = pnand %p525_p1, %p522_p0 }
   0x9   :  { %530 = shalt.err (!%p527_p2)
}
   0xa   :  { %s531_s29 = scalar_lea.vmem %s34_s19, 256  ;;  %p536_p4 = scmp.lt.s32.totalorder %s34_s19, %s34_s19 }
   0xb   :  { %p532_p3 = scmp.ne.s32.totalorder %s34_s19, %s531_s29  ;;  %p537_p5 = scmp.lt.s32.totalorder %s531_s29, %s531_s29 }
   0xd   :  { %p538_p6 = por %p537_p5, %p536_p4 }
   0xf   :  { %p539_p7 = pnand %p538_p6, %p532_p3 }
  0x11   :  { %542 = shalt.err (!%p539_p7)
}
  0x12   :  { %s617_s30 = smov 128   ;;  %s618_s6 = smov 8  }
  0x13   :  { %39 = dma.hbm_to_vmem [thread:$0]  %s757_s3, 256, %s34_s19, [#allocation8], %s617_s30, %s617_s30, %s618_s6  }
  0x14   :  { %s543_s11 = scalar_lea.hbm %s755_s1, 256 }
  0x15   :  { %p544_p8 = scmp.ne.s32.totalorder %s755_s1, %s543_s11  ;;  %p547_p9 = scmp.lt.u32.totalorder %s543_s11, %s755_s1 }
  0x17   :  { %p549_p10 = pnand %p547_p9, %p544_p8 }
  0x19   :  { %552 = shalt.err (!%p549_p10)
}
  0x1a   :  { %s553_s16 = scalar_lea.vmem %s660_s21, 256  ;;  %p558_p12 = scmp.lt.s32.totalorder %s660_s21, %s660_s21 }
  0x1b   :  { %p554_p11 = scmp.ne.s32.totalorder %s660_s21, %s553_s16  ;;  %p559_p13 = scmp.lt.s32.totalorder %s553_s16, %s553_s16 }
  0x1d   :  { %p560_p0 = por %p559_p13, %p558_p12 }
  0x1f   :  { %p561_p1 = pnand %p560_p0, %p554_p11 }
  0x21   :  { %564 = shalt.err (!%p561_p1)
}
  0x22   :  { %25 = dma.hbm_to_vmem [thread:$0]  %s755_s1, 256, %s660_s21, [#allocation5], %s617_s30, %s617_s30, %s618_s6  }
  0x23   :  { %s619_s18 = smov [#allocation9]   ;;  %s565_s23 = scalar_lea.hbm %s758_s4, 256 }
  0x24   :  { %s45_s19 = sshll.u32 %s619_s18, 4  ;;  %p566_p2 = scmp.ne.s32.totalorder %s758_s4, %s565_s23  ;;  %s46_s19 = int_to_ptr.vmem [resolvable:$true] %s45_s19 }
  0x25   :  { %p569_p3 = scmp.lt.u32.totalorder %s565_s23, %s758_s4 }
  0x27   :  { %p571_p4 = pnand %p569_p3, %p566_p2 }
  0x29   :  { %574 = shalt.err (!%p571_p4)
}
  0x2a   :  { %s575_s28 = scalar_lea.vmem %s46_s19, 256  ;;  %p580_p6 = scmp.lt.s32.totalorder %s46_s19, %s46_s19 }
  0x2b   :  { %p576_p5 = scmp.ne.s32.totalorder %s46_s19, %s575_s28  ;;  %p581_p7 = scmp.lt.s32.totalorder %s575_s28, %s575_s28 }
  0x2d   :  { %p582_p8 = por %p581_p7, %p580_p6 }
  0x2f   :  { %p583_p9 = pnand %p582_p8, %p576_p5 }
  0x31   :  { %586 = shalt.err (!%p583_p9)
}
  0x32   :  { %51 = dma.hbm_to_vmem [thread:$0]  %s758_s4, 256, %s46_s19, [#allocation8], %s617_s30, %s617_s30, %s618_s6  }
  0x33   :  { %609 = dma.done.wait [#allocation5], 256  }
  0x34   :  { %610 = vsyncadd [#allocation5], 4294967040 }
  0x35   :  { %611 = dma.done.wait [#allocation8], 512  }
  0x36   :  { %612 = vsyncadd [#allocation8], 4294966784  ;;  %v64_v0 = vlaneseq  ;;  %v620_v1 = vmov 0.0|0.0   ;;  %v66_v2 = vstv %s754_s0  ;;  %vm621_vm0 = vmmov 0   ;;  %v286_v7 = vld [vmem:[#allocation9] sm:$0xff]  ;;  %v287_v8 = vld [vmem:[#allocation9 + $0x8] sm:$0xff] }
  0x37   :  { %491 = vmatprep.subr.bf16.mxu1 %v620_v1  ;;  %494 = vmatprep.subr.bf16.mxu0 %v620_v1  ;;  %v622_v3 = vmov 0.0   ;;  %v284_v9 = vld [vmem:[#allocation7] sm:$0xff]  ;;  %v492_v10 = vpack.c.bf16 %v287_v8, %v286_v7  ;;  %v285_v11 = vld [vmem:[#allocation7 + $0x8] sm:$0xff]  ;;  %v460_v12 = vld [vmem:[%s756_s2] ss:$0 sm:$0xff]  ;;  %s629_s0 = smov [#allocation10]  }
  0x38   :  { %481 = vmatprep.mubr.msk.f32.mxu1 %vm621_vm0, %v622_v3  ;;  %488 = vmatprep.mubr.msk.f32.mxu0 %vm621_vm0, %v622_v3  ;;  %v65_v4 = vshrl.u32 %v64_v0, 7  ;;  %v495_v13 = vpack.c.bf16 %v285_v11, %v284_v9  ;;  %v623_v26 = vmov 683565275   ;;  %v624_v28 = vmov 2475754826   ;;  %s447_s2 = sshll.u32 %s629_s0, 4  ;;  %s448_s2 = int_to_ptr.vmem [resolvable:$true] %s447_s2 }
  0x39   :  { %493 = vmatpush3.bf16.msra.mxu1 %v492_v10  ;;  %v625_v30 = vmov 2131351028   ;;  %v626_v32 = vmov 2102212464   ;;  %v627_v34 = vmov 920167782   ;;  %p592_p11 = scmp.lt.s32.totalorder %s448_s2, %s448_s2 }
  0x3a   :  { %v67_v5 = vadd.s32 %v66_v2, %v65_v4  ;;  %496 = vmatpush3.bf16.msra.mxu0 %v495_v13  ;;  %v628_v41 = vmov 1326507024   ;;  %s587_s9 = scalar_lea.vmem %s448_s2, 256 }
  0x3b   :  { %p588_p10 = scmp.ne.s32.totalorder %s448_s2, %s587_s9  ;;  %p593_p12 = scmp.lt.s32.totalorder %s587_s9, %s587_s9 }
  0x3c   :  { %v68_v6 = vcvt.s32.f32 %v67_v5 }
  0x3d   :  { %p594_p13 = por %p593_p12, %p592_p11 }
  0x3e   :  { %v718_v14 = vmul.f32 %v460_v12, %v68_v6 }
  0x3f   :  { %p595_p0 = pnand %p594_p13, %p588_p10 }
  0x40   :  { %v80_v15 = vand.u32 2139095040, %v718_v14  ;;  %v77_v17 = vand.u32 2147483647, %v718_v14  ;;  %vm79_vm8 = vcmp.lt.s32.totalorder %v718_v14, 0  ;;  %vm169_vm0 = vweird.f32 %v718_v14 }
  0x42   :  { %v81_v16 = vshrl.u32 %v80_v15, 23  ;;  %v84_v20 = vand.u32 8388607, %v77_v17  ;;  %vm78_vm9 = vcmp.le.f32.partialorder %v77_v17, 0.7853982 }
  0x44   :  { %v461_v18 = vadd.s32 4294967169, %v81_v16  ;;  %v85_v23 = vor.u32 8388608, %v84_v20 }
  0x46   :  { %v87_v19 = vadd.s32 1, %v461_v18  ;;  %v125_v43 = vshll.u32 %v85_v23, 8 }
  0x48   :  { %vm88_vm1 = vcmp.gt.s32.totalorder %v87_v19, 0 }
  0x49   :  { %v89_v21 = vsel %vm88_vm1, %v87_v19, 0  ;;  %vm288_vm1 = vcmask 130048  }
  0x4a   :  { %v91_v22 = vand.u32 31, %v89_v21  ;;  %v90_v24 = vshrl.u32 %v89_v21, 5 }
  0x4c   :  { %v92_v25 = vsub.s32 32, %v91_v22  ;;  %v94_v27 = vshll.u32 %v623_v26, %v91_v22  ;;  %v97_v29 = vshll.u32 %v624_v28, %v91_v22  ;;  %v100_v31 = vshll.u32 %v625_v30, %v91_v22 }
  0x4d   :  { %v103_v33 = vshll.u32 %v626_v32, %v91_v22  ;;  %v106_v35 = vshll.u32 %v627_v34, %v91_v22  ;;  %vm109_vm2 = vcmp.lt.s32.totalorder %v90_v24, 1  ;;  %vm112_vm3 = vcmp.lt.s32.totalorder %v90_v24, 4 }
  0x4e   :  { %v93_v36 = vshrl.u32 %v623_v26, %v92_v25  ;;  %v95_v37 = vshrl.u32 %v624_v28, %v92_v25  ;;  %v98_v38 = vshrl.u32 %v625_v30, %v92_v25  ;;  %v101_v39 = vshrl.u32 %v626_v32, %v92_v25 }
  0x4f   :  { %v104_v40 = vshrl.u32 %v627_v34, %v92_v25  ;;  %v107_v42 = vshrl.u32 %v628_v41, %v92_v25  ;;  %vm110_vm4 = vcmp.lt.s32.totalorder %v90_v24, 2  ;;  %vm111_vm5 = vcmp.lt.s32.totalorder %v90_v24, 3 }
  0x50   :  { %v96_v44 = vor.u32 %v95_v37, %v94_v27  ;;  %v99_v45 = vor.u32 %v98_v38, %v97_v29  ;;  %v102_v46 = vor.u32 %v101_v39, %v100_v31 }
  0x51   :  { %v105_v47 = vor.u32 %v104_v40, %v103_v33  ;;  %v108_v48 = vor.u32 %v107_v42, %v106_v35 }
  0x52   :  { %v113_v49 = vsel %vm109_vm2, %v93_v36, %v96_v44  ;;  %v114_v50 = vsel %vm112_vm3, %v102_v46, 2102212464  ;;  %v117_v51 = vsel %vm109_vm2, %v96_v44, %v99_v45  ;;  %v121_v52 = vsel %vm109_vm2, %v99_v45, %v102_v46 }
  0x53   :  { %v115_v53 = vsel %vm111_vm5, %v99_v45, %v114_v50  ;;  %v118_v54 = vsel %vm112_vm3, %v105_v47, 920167782  ;;  %v122_v55 = vsel %vm112_vm3, %v108_v48, 1326507024  ;;  %v435_v50 = vld [vmem:[#allocation4] sm:$0xff]  ;;  %vm439_vm2 = vcmask 261120  }
  0x54   :  { %v119_v56 = vsel %vm111_vm5, %v102_v46, %v118_v54  ;;  %v123_v57 = vsel %vm111_vm5, %v105_v47, %v122_v55  ;;  %v116_v58 = vsel %vm110_vm4, %v113_v49, %v115_v53 }
  0x55   :  { %v120_v59 = vsel %vm110_vm4, %v117_v51, %v119_v56  ;;  %v124_v60 = vsel %vm110_vm4, %v121_v52, %v123_v57  ;;  %v132_v1 = vmul.u32 %v125_v43, %v116_v58  ;;  %v436_v51 = vld [vmem:[#allocation4 + $0x8] sm:$0xff] }
  0x56   :  { %v724_v61 = vmul.u32.u64.low %v125_v43, %v124_v60  ;;  %v725_v62 = vmul.u32.u64.high %v125_v43, %v124_v60, %v724_v61  ;;  %v727_v63 = vmul.u32.u64.low %v125_v43, %v120_v59  ;;  %v728_v0 = vmul.u32.u64.high %v125_v43, %v120_v59, %v727_v63 }
  0x58   :  { %vm134_vm6 = vc.u32 %v725_v62, %v727_v63  ;;  %v135_v2 = vadd.s32 1, %v728_v0  ;;  %v133_v13 = vadd.s32 %v727_v63, %v725_v62 }
  0x5a   :  { %v136_v3 = vsel %vm134_vm6, %v135_v2, %v728_v0 }
  0x5b   :  { %v137_v4 = vadd.s32 %v136_v3, %v132_v1 }
  0x5d   :  { %v138_v5 = vadd.s32 536870912, %v137_v4 }
  0x5f   :  { %v139_v6 = vshrl.u32 %v138_v5, 30 }
  0x61   :  { %v140_v7 = vshll.u32 %v139_v6, 30  ;;  %v163_v27 = vsub.s32 4, %v139_v6 }
  0x63   :  { %v141_v8 = vsub.s32 %v137_v4, %v140_v7  ;;  %v164_v30 = vsel %vm79_vm8, %v163_v27, %v139_v6 }
  0x64   :  { %v166_v33 = vsel %vm78_vm9, 0, %v164_v30 }
  0x65   :  { %v143_v9 = vsub.s32 0, %v141_v8  ;;  %v170_v34 = vadd.s32 3, %v166_v33  ;;  %v274_v35 = vand.u32 3, %v166_v33 }
  0x67   :  { %v462_v10 = vmin.u32 %v143_v9, %v141_v8  ;;  %v171_v36 = vand.u32 3, %v170_v34  ;;  %vm279_vm10 = vcmp.eq.s32.totalorder %v274_v35, 2  ;;  %vm276_vm12 = vcmp.eq.s32.totalorder %v274_v35, 0 }
  0x68   :  { %vm275_vm14 = vcmp.lt.s32.totalorder %v274_v35, 2 }
  0x69   :  { %v145_v11 = vclz %v462_v10  ;;  %vm176_vm11 = vcmp.eq.s32.totalorder %v171_v36, 2  ;;  %vm173_vm13 = vcmp.eq.s32.totalorder %v171_v36, 0  ;;  %vm172_vm15 = vcmp.lt.s32.totalorder %v171_v36, 2 }
  0x6b   :  { %v463_v12 = vadd.s32 4294967294, %v145_v11 }
  0x6d   :  { %vm464_vm7 = vcmp.lt.s32.totalorder %v463_v12, 0 }
  0x6e   :  { %v148_v15 = vsel %vm464_vm7, 0, %v463_v12 }
  0x6f   :  { %v149_v16 = vsub.s32 32, %v148_v15  ;;  %v150_v18 = vshll.u32 %v141_v8, %v148_v15  ;;  %v153_v19 = vsub.s32 4294967266, %v148_v15 }
  0x71   :  { %v151_v20 = vshrl.u32 %v133_v13, %v149_v16  ;;  %v154_v21 = vadd.s32 127, %v153_v19 }
  0x73   :  { %v152_v22 = vor.u32 %v151_v20, %v150_v18  ;;  %v155_v23 = vshll.u32 %v154_v21, 23 }
  0x75   :  { %v156_v24 = vor.u32 4788187, %v155_v23  ;;  %v159_v25 = vcvt.s32.f32 %v152_v22 }
  0x77   :  { %v157_v26 = vand.u32 2147483647, %v156_v24 }
  0x79   :  { %v160_v28 = vmul.f32 %v159_v25, %v157_v26 }
  0x7b   :  { %v161_v29 = vxor.u32 2147483648, %v160_v28 }
  0x7d   :  { %v162_v31 = vsel %vm79_vm8, %v161_v29, %v160_v28 }
  0x7e   :  { %v165_v32 = vsel %vm78_vm9, %v718_v14, %v162_v31 }
  0x7f   :  { %517 = vcosq.f32 %v165_v32 }
  0x80   :  { %519 = vsinq.f32 %v165_v32 }
  0x89   :  { %v518_v37 = vpop.eup %517 }
  0x8a   :  { %v520_v38 = vpop.eup %519  ;;  %v177_v39 = vxor.u32 2147483648, %v518_v37 }
  0x8b   :  { %v174_v40 = vxor.u32 2147483648, %v520_v38 }
  0x8c   :  { %v281_v17 = vsel %vm279_vm10, %v177_v39, %v520_v38  ;;  %v178_v41 = vsel %vm176_vm11, %v177_v39, %v520_v38 }
  0x8d   :  { %v278_v42 = vsel %vm276_vm12, %v518_v37, %v174_v40  ;;  %v175_v43 = vsel %vm173_vm13, %v518_v37, %v174_v40 }
  0x8e   :  { %v282_v44 = vsel %vm275_vm14, %v278_v42, %v281_v17  ;;  %v179_v45 = vsel %vm172_vm15, %v175_v43, %v178_v41 }
  0x8f   :  { %v283_v46 = vsel %vm169_vm0, nan, %v282_v44  ;;  %v180_v47 = vsel %vm169_vm0, nan, %v179_v45 }
  0x90   :  { %482 = vmatmul.mubr.msk.f32.vlgmr.msra.gmra.mrb[0].mxu1 %vm288_vm1, %v283_v46  ;;  %489 = vmatmul.mubr.msk.f32.vlgmr.msra.gmra.mrb[0].mxu0 %vm288_vm1, %v180_v47 }
 0x163   :  { %v358_v48 = vpop.f32.mrb[0].mxu1  ;;  %v431_v49 = vpop.f32.mrb[0].mxu0 }
 0x164   :  { %v432_v52 = vadd.f32 %v431_v49, %v358_v48  ;;  %v483_v53 = vpop.f32.mrb[1].mxu1  ;;  %v490_v14 = vpop.f32.mrb[1].mxu0 }
 0x166   :  { %v437_v54 = vadd.f32 %v435_v50, %v432_v52  ;;  %v438_v55 = vadd.f32 %v436_v51, %v432_v52 }
 0x168   :  { %440 = vst.msk [vmem:[#allocation10] sm:$0xff] %vm439_vm2, %v437_v54  ;;  %441 = vst.msk [vmem:[#allocation10 + $0x8] sm:$0xff] %vm439_vm2, %v438_v55 }
 0x169   :  { %598 = shalt.err (!%p595_p0)
}
 0x16a   :  { %s599_s12 = scalar_lea.hbm %s759_s5, 256 }
 0x16b   :  { %p600_p1 = scmp.ne.s32.totalorder %s759_s5, %s599_s12  ;;  %p603_p2 = scmp.lt.u32.totalorder %s599_s12, %s759_s5 }
 0x16d   :  { %p605_p3 = pnand %p603_p2, %p600_p1 }
 0x16f   :  { %608 = shalt.err (!%p605_p3)
}
 0x170   :  { %453 = dma.vmem_to_hbm [thread:$0]  %s448_s2, 256, %s759_s5, [#allocation6], %s617_s30, %s617_s30, %s618_s6  }
 0x171   :  { %613 = dma.done.wait [#allocation6], 256  }
 0x172   :  { %614 = vsyncadd [#allocation6], 4294967040 }
 0x173   :  { %457 = vsyncpa [#allocation5], 1 }
 0x174   :  { %458 = vsyncpa [#allocation8], 1 }
 0x175   :  { %459 = vsyncpa [#allocation6], 1 }

</bundles_post_ra>
